<compile_context>
chip_gen: v5e
topology: v5e:2x2
jax: 0.10.0
libtpu: 0.0.40
codegen_flags: <defaults>
</compile_context>

<pallas_src>
import functools

import jax
import jax.numpy as jnp
from jax.experimental import pallas as pl
from jax.experimental.pallas import tpu as pltpu


def _round_up(a, b):
    return ((a + b - 1) // b) * b


def _pick_tile(dim, target, align):
    """Largest useful tile.

    If the padded dim fits inside `target`, use the whole (padded) dim.
    Otherwise pick the largest multiple of `align` that divides the padded dim
    and is <= target (no wasted padded compute, few grid steps).
    """
    padded = _round_up(dim, align)
    if padded <= target:
        return padded
    units = padded // align
    best = 1
    for d in range(1, units + 1):
        if units % d == 0 and d * align <= target:
            best = d
    return best * align


def linear_kernel(x_ref, w_ref, b_ref, o_ref, acc_ref, *, compute_dtype):
    k = pl.program_id(2)

    @pl.when(k == 0)
    def _init():
        acc_ref[...] = jnp.zeros_like(acc_ref)

    # x block: (tm, tk); w block in PyTorch layout: (tn, tk).
    # Contract on the shared D_in axis directly — no transposed copy of W needed.
    x = x_ref[...].astype(compute_dtype)
    w = w_ref[...].astype(compute_dtype)
    acc_ref[...] += jax.lax.dot_general(
        x, w,
        dimension_numbers=(((1,), (1,)), ((), ())),
        preferred_element_type=jnp.float32,
    )

    @pl.when(k == pl.num_programs(2) - 1)
    def _finalize():
        # Bias added exactly once, in the finalize branch.
        o_ref[...] = (acc_ref[...] + b_ref[...]).astype(o_ref.dtype)


def linear_forward(x, weight, bias, *, compute_dtype=jnp.float32,
                   tm_target=256, tn_target=256, tk_target=512):
    """Pallas equivalent of nn.Linear(input_dim, output_dim).forward.

    x:      (B, D_in)      float32
    weight: (D_out, D_in)  float32  (PyTorch layout — NOT pre-transposed)
    bias:   (D_out,)       float32
    returns (B, D_out)     float32

    compute_dtype=jnp.bfloat16 enables the bf16-MXU / f32-accumulate recipe
    (recommended on v6e/v7x); float32 default keeps exact nn.Linear numerics.
    """
    B, d_in = x.shape
    d_out, d_in_w = weight.shape
    assert d_in_w == d_in
    assert bias.shape == (d_out,)

    # Tile sizes aligned to the (8, 128) vreg layout; multiples of 128 work on all
    # of v5e / v6e / v7x, 256-sized tiles fill the larger v6e/v7x MXUs when possible.
    tm = _pick_tile(B, tm_target, 8)
    tn = _pick_tile(d_out, tn_target, 128)
    tk = _pick_tile(d_in, tk_target, 128)

    Mp = _round_up(B, tm)
    Np = _round_up(d_out, tn)
    Kp = _round_up(d_in, tk)

    # Zero-pad to tile multiples (cheap glue). K-padding contributes exactly 0 to the
    # dot; padded M rows / N cols are sliced off below. Crucially, Np is a multiple of
    # 128 so the kernel's output stores are lane-dense (no masked partial stores).
    xp = x if (Mp == B and Kp == d_in) else jnp.pad(x, ((0, Mp - B), (0, Kp - d_in)))
    wp = weight if (Np == d_out and Kp == d_in) else jnp.pad(
        weight, ((0, Np - d_out), (0, Kp - d_in)))
    bp = jnp.pad(bias, (0, Np - d_out)).reshape(1, Np)

    grid = (Mp // tm, Np // tn, Kp // tk)

    bytes_per = jnp.dtype(x.dtype).itemsize
    cost = pl.CostEstimate(
        flops=2 * Mp * Np * Kp,
        transcendentals=0,
        bytes_accessed=bytes_per * (Mp * Kp + Np * Kp + Mp * Np + Np),
    )

    out = pl.pallas_call(
        functools.partial(linear_kernel, compute_dtype=compute_dtype),
        out_shape=jax.ShapeDtypeStruct((Mp, Np), x.dtype),
        grid_spec=pltpu.PrefetchScalarGridSpec(
            num_scalar_prefetch=0,
            grid=grid,
            in_specs=[
                pl.BlockSpec((tm, tk), lambda i, j, k: (i, k)),   # x tile
                pl.BlockSpec((tn, tk), lambda i, j, k: (j, k)),   # W tile (PyTorch layout)
                pl.BlockSpec((1, tn), lambda i, j, k: (0, j)),    # bias tile
            ],
            out_specs=pl.BlockSpec((tm, tn), lambda i, j, k: (i, j)),
            scratch_shapes=[pltpu.VMEM((tm, tn), jnp.float32)],
        ),
        compiler_params=pltpu.CompilerParams(
            dimension_semantics=("parallel", "parallel", "arbitrary"),
            vmem_limit_bytes=32 * 1024 * 1024,  # explicit, with large headroom (~3 MiB live)
        ),
        cost_estimate=cost,
    )(xp, wp, bp)

    return out[:B, :d_out]


if __name__ == "__main__":
    key = jax.random.PRNGKey(0)
    kx, kw, kb = jax.random.split(key, 3)

    batch, input_dim, output_dim = 8, 32, 16

    # Deterministic init mimicking PyTorch nn.Linear default:
    # uniform(-1/sqrt(input_dim), 1/sqrt(input_dim)).
    bound = 1.0 / jnp.sqrt(jnp.float32(input_dim))
    weight = jax.random.uniform(kw, (output_dim, input_dim),
                                minval=-bound, maxval=bound, dtype=jnp.float32)
    bias = jax.random.uniform(kb, (output_dim,),
                              minval=-bound, maxval=bound, dtype=jnp.float32)
    x = jax.random.normal(kx, (batch, input_dim), dtype=jnp.float32)

    # f32 path: exact nn.Linear semantics.
    y = jax.block_until_ready(linear_forward(x, weight, bias))
    y_ref = x @ weight.T + bias
    assert y.shape == (batch, output_dim)
    assert jnp.allclose(y, y_ref, atol=1e-5, rtol=1e-5)

    # bf16-MXU / f32-accumulate path (v6e/v7x throughput recipe).
    y_bf16 = jax.block_until_ready(
        linear_forward(x, weight, bias, compute_dtype=jnp.bfloat16))
    assert jnp.allclose(y_bf16, y_ref, atol=5e-2, rtol=5e-2)

    # Moderate shape exercising the real tiled grid: multiple M / N / K blocks,
    # accumulator init/finalize, non-target-divisible K picked by divisor search.
    B2, D_in2, D_out2 = 512, 768, 384   # tm=256x2, tn=128x3, tk=384x2
    x2 = jax.random.normal(kx, (B2, D_in2), dtype=jnp.float32)
    w2 = jax.random.normal(kw, (D_out2, D_in2), dtype=jnp.float32) * 0.02
    b2 = jax.random.normal(kb, (D_out2,), dtype=jnp.float32)
    y2 = jax.block_until_ready(linear_forward(x2, w2, b2))
    y2_ref = x2 @ w2.T + b2
    assert y2.shape == (B2, D_out2)
    assert jnp.allclose(y2, y2_ref, atol=2e-2, rtol=2e-2)

    print("KERNEL_OK")
</pallas_src>

<mosaic_0001>
module attributes {stable_mosaic.version = 11 : i64} {
  func.func @linear_kernel(%arg0: i32, %arg1: i32, %arg2: i32, %arg3: memref<8x128xf32, #tpu.memory_space<vmem>>, %arg4: memref<128x128xf32, #tpu.memory_space<vmem>>, %arg5: memref<1x128xf32, #tpu.memory_space<vmem>>, %arg6: memref<8x128xf32, #tpu.memory_space<vmem>>, %arg7: memref<8x128xf32, #tpu.memory_space<vmem>>) attributes {dimension_semantics = [#tpu.dimension_semantics<parallel>, #tpu.dimension_semantics<parallel>, #tpu.dimension_semantics<arbitrary>], iteration_bounds = array<i64: 1, 1, 1>, scalar_prefetch = 0 : i64, scratch_operands = 1 : i64, tpu.core_type = #tpu.core_type<tc>, window_params = [{transform_indices = @transform_0, window_bounds = array<i64: 8, 128>}, {transform_indices = @transform_1, window_bounds = array<i64: 128, 128>}, {transform_indices = @transform_2, window_bounds = array<i64: 1, 128>}, {transform_indices = @transform_3, window_bounds = array<i64: 8, 128>}]} {
    %c0_i32 = arith.constant 0 : i32
    %0 = arith.cmpi eq, %arg2, %c0_i32 : i32
    %1 = arith.extui %0 : i1 to i32
    %c0_i32_0 = arith.constant 0 : i32
    %2 = arith.cmpi ne, %1, %c0_i32_0 : i32
    scf.if %2 {
      %cst_10 = arith.constant 0.000000e+00 : f32
      %12 = vector.broadcast %cst_10 : f32 to vector<8x128xf32>
      %c0_11 = arith.constant 0 : index
      %c0_12 = arith.constant 0 : index
      %13 = vector.load %arg7[%c0_11, %c0_12] : memref<8x128xf32, #tpu.memory_space<vmem>>, vector<8x128xf32>
      tpu.vector_store %arg7[%c0_11, %c0_12], %12 {strides = array<i32>} : memref<8x128xf32, #tpu.memory_space<vmem>>, vector<8x128xf32>,
    } else {
    }
    %c0 = arith.constant 0 : index
    %c0_1 = arith.constant 0 : index
    %3 = vector.load %arg3[%c0, %c0_1] : memref<8x128xf32, #tpu.memory_space<vmem>>, vector<8x128xf32>
    %c0_2 = arith.constant 0 : index
    %c0_3 = arith.constant 0 : index
    %4 = vector.load %arg4[%c0_2, %c0_3] : memref<128x128xf32, #tpu.memory_space<vmem>>, vector<128x128xf32>
    %c0_4 = arith.constant 0 : index
    %c0_5 = arith.constant 0 : index
    %5 = vector.load %arg7[%c0_4, %c0_5] : memref<8x128xf32, #tpu.memory_space<vmem>>, vector<8x128xf32>
    %cst = arith.constant dense<0.000000e+00> : vector<8x128xf32>
    %6 = tpu.matmul %3, %4, %cst {dimension_numbers = #tpu.dot_dimension_numbers<[1], [1], [0], [0], [0, 0, 1, 0], [], []>} : vector<8x128xf32>, vector<128x128xf32>, vector<8x128xf32> -> vector<8x128xf32>
    %7 = arith.addf %5, %6 : vector<8x128xf32>
    %c0_6 = arith.constant 0 : index
    %c0_7 = arith.constant 0 : index
    %8 = vector.load %arg7[%c0_6, %c0_7] : memref<8x128xf32, #tpu.memory_space<vmem>>, vector<8x128xf32>
    tpu.vector_store %arg7[%c0_6, %c0_7], %7 {strides = array<i32>} : memref<8x128xf32, #tpu.memory_space<vmem>>, vector<8x128xf32>,
    %c0_i32_8 = arith.constant 0 : i32
    %9 = arith.cmpi eq, %arg2, %c0_i32_8 : i32
    %10 = arith.extui %9 : i1 to i32
    %c0_i32_9 = arith.constant 0 : i32
    %11 = arith.cmpi ne, %10, %c0_i32_9 : i32
    scf.if %11 {
      %c0_10 = arith.constant 0 : index
      %c0_11 = arith.constant 0 : index
      %12 = vector.load %arg7[%c0_10, %c0_11] : memref<8x128xf32, #tpu.memory_space<vmem>>, vector<8x128xf32>
      %c0_12 = arith.constant 0 : index
      %c0_13 = arith.constant 0 : index
      %13 = vector.load %arg5[%c0_12, %c0_13] : memref<1x128xf32, #tpu.memory_space<vmem>>, vector<1x128xf32>
      %14 = vector.broadcast %13 : vector<1x128xf32> to vector<8x128xf32>
      %15 = arith.addf %12, %14 : vector<8x128xf32>
      %c0_14 = arith.constant 0 : index
      %c0_15 = arith.constant 0 : index
      %16 = vector.load %arg6[%c0_14, %c0_15] : memref<8x128xf32, #tpu.memory_space<vmem>>, vector<8x128xf32>
      tpu.vector_store %arg6[%c0_14, %c0_15], %15 {strides = array<i32>} : memref<8x128xf32, #tpu.memory_space<vmem>>, vector<8x128xf32>,
    } else {
    }
    return
  }
  func.func @transform_0(%arg0: i32, %arg1: i32, %arg2: i32) -> (i32, i32) {
    %c0_i32 = arith.constant 0 : i32
    return %arg0, %arg2 : i32, i32
  }
  func.func @transform_1(%arg0: i32, %arg1: i32, %arg2: i32) -> (i32, i32) {
    %c0_i32 = arith.constant 0 : i32
    return %arg1, %arg2 : i32, i32
  }
  func.func @transform_2(%arg0: i32, %arg1: i32, %arg2: i32) -> (i32, i32) {
    %c0_i32 = arith.constant 0 : i32
    %c0_i32_0 = arith.constant 0 : i32
    return %c0_i32, %arg1 : i32, i32
  }
  func.func @transform_3(%arg0: i32, %arg1: i32, %arg2: i32) -> (i32, i32) {
    %c0_i32 = arith.constant 0 : i32
    return %arg0, %arg1 : i32, i32
  }
}

</mosaic_0001>

<bundles_post_ra>
// kernel: tpu_custom_call.1
= control target key start
LH: loop header
LB: loop body
LE: loop exit
PB: predicated region body
PF: predicated region fallthrough
CT: control target
= control target key end

     0   :  { %8 = vsyncpa [#allocation4], 0  ;;  %s239_s0 = inlined_call_operand.hbm [shape: f32[8,128], index: 0, kind: input, shape index: {}]   ;;  %s240_s1 = inlined_call_operand.hbm [shape: f32[128,128], index: 1, kind: input, shape index: {}]   ;;  %s241_s2 = inlined_call_operand.vmem [shape: f32[1,128], index: 2, kind: input, shape index: {}]   ;;  %s242_s3 = inlined_call_operand.hbm [shape: f32[8,128], index: 3, kind: output, shape index: {}]  }
   0x1   :  { %9 = vsyncpa [#allocation7], 0 }
   0x2   :  { %10 = vsyncpa [#allocation5], 0  ;;  %s16_s14 = sshll.u32 %s239_s0, 4  ;;  %s202_s15 = smov [#allocation3]   ;;  %s17_s14 = int_to_ptr.hbm [resolvable:$true] %s16_s14 }
   0x3   :  { %s18_s16 = sshll.u32 %s202_s15, 4  ;;  %s26_s19 = sshll.u32 %s240_s1, 4  ;;  %s19_s16 = int_to_ptr.vmem [resolvable:$true] %s18_s16  ;;  %s27_s19 = int_to_ptr.hbm [resolvable:$true] %s26_s19 }
   0x4   :  { %21 = dma.hbm_to_vmem [thread:$0]  %s17_s14, 128, %s19_s16, [#allocation4]  }
   0x5   :  { %s203_s20 = smov [#allocation6]   ;;  %s204_s22 = smov 128  }
   0x6   :  { %s28_s21 = sshll.u32 %s203_s20, 4  ;;  %s205_s23 = smov 8   ;;  %s29_s21 = int_to_ptr.vmem [resolvable:$true] %s28_s21 }
   0x7   :  { %34 = dma.hbm_to_vmem [thread:$0]  %s27_s19, 2048, %s29_s21, [#allocation7], %s204_s22, %s204_s22, %s205_s23  }
   0x8   :  { %196 = dma.done.wait [#allocation4], 128  }
   0x9   :  { %197 = vsyncadd [#allocation4], 4294967168 }
   0xa   :  { %198 = dma.done.wait [#allocation7], 2048  }
   0xb   :  { %199 = vsyncadd [#allocation7], 4294965248  ;;  %v66_v0 = vld [vmem:[#allocation6 + $0x78] sm:$0xff]  ;;  %v65_v1 = vld [vmem:[#allocation6 + $0x70] sm:$0xff]  ;;  %s206_s24 = smov [#allocation8]   ;;  %s107_s28 = sshll.u32 %s242_s3, 4  ;;  %s108_s28 = int_to_ptr.hbm [resolvable:$true] %s107_s28 }
   0xc   :  { %68 = vmatpush.xpose.msra.mxu0 %v66_v0  ;;  %v64_v2 = vld [vmem:[#allocation6 + $0x68] sm:$0xff]  ;;  %v63_v3 = vld [vmem:[#allocation6 + $0x60] sm:$0xff]  ;;  %v62_v4 = vld [vmem:[#allocation6 + $0x58] sm:$0xff]  ;;  %s105_s25 = sshll.u32 %s206_s24, 4  ;;  %s106_s25 = int_to_ptr.vmem [resolvable:$true] %s105_s25 }
   0xd   :  { %v61_v5 = vld [vmem:[#allocation6 + $0x50] sm:$0xff]  ;;  %v60_v6 = vld [vmem:[#allocation6 + $0x48] sm:$0xff]  ;;  %v59_v7 = vld [vmem:[#allocation6 + $0x40] sm:$0xff] }
   0xe   :  { %v58_v8 = vld [vmem:[#allocation6 + $0x38] sm:$0xff]  ;;  %v57_v9 = vld [vmem:[#allocation6 + $0x30] sm:$0xff]  ;;  %v56_v10 = vld [vmem:[#allocation6 + $0x28] sm:$0xff] }
   0xf   :  { %v55_v11 = vld [vmem:[#allocation6 + $0x20] sm:$0xff]  ;;  %v54_v12 = vld [vmem:[#allocation6 + $0x18] sm:$0xff]  ;;  %v53_v13 = vld [vmem:[#allocation6 + $0x10] sm:$0xff] }
  0x10   :  { %69 = vmatpush.xpose.msra.mxu0 %v65_v1  ;;  %v52_v14 = vld [vmem:[#allocation6 + $0x8] sm:$0xff]  ;;  %v51_v15 = vld [vmem:[#allocation6] sm:$0xff]  ;;  %v50_v16 = vld [vmem:[#allocation3] sm:$0xff] }
  0x11   :  { %v123_v17 = vld [vmem:[%s241_s2] ss:$0 sm:$0xff] }
  0x14   :  { %70 = vmatpush.xpose.msra.mxu0 %v64_v2 }
  0x18   :  { %71 = vmatpush.xpose.msra.mxu0 %v63_v3 }
  0x1c   :  { %72 = vmatpush.xpose.msra.mxu0 %v62_v4 }
  0x20   :  { %73 = vmatpush.xpose.msra.mxu0 %v61_v5 }
  0x24   :  { %74 = vmatpush.xpose.msra.mxu0 %v60_v6 }
  0x28   :  { %75 = vmatpush.xpose.msra.mxu0 %v59_v7 }
  0x2c   :  { %76 = vmatpush.xpose.msra.mxu0 %v58_v8 }
  0x30   :  { %77 = vmatpush.xpose.msra.mxu0 %v57_v9 }
  0x34   :  { %78 = vmatpush.xpose.msra.mxu0 %v56_v10 }
  0x38   :  { %79 = vmatpush.xpose.msra.mxu0 %v55_v11 }
  0x3c   :  { %80 = vmatpush.xpose.msra.mxu0 %v54_v12 }
  0x40   :  { %81 = vmatpush.xpose.msra.mxu0 %v53_v13 }
  0x44   :  { %82 = vmatpush.xpose.msra.mxu0 %v52_v14 }
  0x48   :  { %83 = vmatpush.xpose.msra.mxu0 %v51_v15 }
  0x4b   :  { %84 = vmatmul.f32.vlgmr.msra.gmra.mxu0 %v50_v16 }
  0xc8   :  { %v85_v18 = vpop.f32.mrf.mxu0 }
  0xc9   :  { %v98_v19 = vadd.f32 %v123_v17, %v85_v18 }
  0xcb   :  { %99 = vst [vmem:[#allocation8] sm:$0xff] %v98_v19 }
  0xcc   :  { %110 = dma.vmem_to_hbm [thread:$0]  %s106_s25, 128, %s108_s28, [#allocation5]  }
  0xcd   :  { %200 = dma.done.wait [#allocation5], 128  }
  0xce   :  { %201 = vsyncadd [#allocation5], 4294967168 }
  0xcf   :  { %115 = vsyncpa [#allocation4], 1 }
  0xd0   :  { %116 = vsyncpa [#allocation7], 1 }
  0xd1   :  { %117 = vsyncpa [#allocation5], 1 }

</bundles_post_ra>
